<compile_context>
chip_gen: v7x
topology: tpu7x:2x2x1
jax: 0.10.0
libtpu: 0.0.40
codegen_flags: <defaults>
</compile_context>

<pallas_src>
import functools
import math

import jax
import jax.numpy as jnp
from jax.experimental import pallas as pl
from jax.experimental.pallas import tpu as pltpu


def _dagma_kernel(layer_dims, x_ref, w1_ref, *rest):
    """One (node-block, batch-block) tile; feature-major [features, batch_tile].

    x_ref : [D+1, TB]     matmul dtype; last row is the constant 1 for the fc1 bias
    w1_ref: [M1*bd, D+1]  fc1 weight slab for this node block, rows hidden-major
                          (row = k*bd + node_local), bias folded into the last column
    per LC layer: weight ref [bd, m_in*m_out] (col = m*m_out + o), bias ref [bd, m_out]
    last ref: output [bd, TB]
    """
    o_ref = rest[-1]
    lc_refs = rest[:-1]
    bd, _ = o_ref.shape

    # fc1 on the MXU (f32 accumulation); result rows are hidden-major within the block.
    h = jnp.dot(w1_ref[...], x_ref[...], preferred_element_type=jnp.float32)  # [m1*bd, TB]

    pos = 0
    for (m_in, m_out) in layer_dims:
        w2 = lc_refs[pos][...]        # [bd, m_in*m_out]  f32
        b = lc_refs[pos + 1][...]     # [bd, m_out]       f32
        pos += 2

        # sigmoid(x) = 0.5*tanh(0.5*x) + 0.5  -- a single EUP transcendental per element.
        h = 0.5 * jnp.tanh(0.5 * h) + 0.5

        # Pure-VPU locally-connected layer (no MXU, no 0/1 reduce matrices):
        #   out[o][node, t] = sum_m h[m*bd + node, t] * w[node, m, o] + b[node, o]
        outs = []
        for o in range(m_out):
            acc = None
            for m in range(m_in):
                hm = h[m * bd:(m + 1) * bd, :]                       # [bd, TB] aligned slice
                wc = w2[:, m * m_out + o:m * m_out + o + 1]          # [bd, 1]
                t = hm * wc
                acc = t if acc is None else acc + t
            outs.append(acc + b[:, o:o + 1])
        # hidden(=o)-major row layout for the next layer / the output block
        h = outs[0] if m_out == 1 else jnp.concatenate(outs, axis=0)

    o_ref[...] = h.astype(o_ref.dtype)


def _round_up(x, m):
    return ((x + m - 1) // m) * m


def _pick_block_d(d_pad, max_bd):
    """Largest node-block size that divides d_pad and keeps (8, *) tiling legal."""
    if d_pad <= max_bd:
        return d_pad
    for bd in range((max_bd // 8) * 8, 0, -8):
        if d_pad % bd == 0:
            return bd
    return 8  # unreachable: d_pad is a multiple of 8


def _vmem_capacity_bytes():
    try:
        cap = getattr(pltpu.get_tpu_info(), "vmem_capacity_bytes", None)
        if cap:
            return int(cap)
    except Exception:
        pass
    return 64 * 2**20  # conservative (v7x-sized) fallback


@functools.partial(jax.jit, static_argnames=("block_n", "block_d", "matmul_dtype"))
def dagma_mlp_forward(x, fc1_w, fc1_b, lc_weights, lc_biases, *,
                      block_n=None, block_d=None, matmul_dtype=jnp.bfloat16):
    n, d = x.shape
    dm1, d2 = fc1_w.shape
    assert d2 == d and dm1 % d == 0
    m1 = dm1 // d
    f32 = jnp.float32

    # ---- generation-aware knobs --------------------------------------------------
    vmem_cap = _vmem_capacity_bytes()
    big_vmem = vmem_cap >= 96 * 2**20            # v5e/v6e: 128 MiB, v7x: 64 MiB
    vmem_limit = int(0.85 * vmem_cap)            # leave headroom for compiler scratch

    # Node axis padded to a multiple of 8 so an aligned node block always exists.
    d_pad = _round_up(d, 8)
    bd = _pick_block_d(d_pad, 256 if big_vmem else 128) if block_d is None else block_d
    assert d_pad % bd == 0 and (bd == d_pad or bd % 8 == 0)

    # Batch tile on the lane axis (multiple of 128): 512 on 128-MiB parts, 256 on v7x.
    if block_n is None:
        block_n = 512 if big_vmem else 256
    tb = min(block_n, _round_up(n, 128))
    tb = max(128, (tb // 128) * 128)
    n_pad = _round_up(n, tb)
    # Keep >= 2 grid steps when possible so both v7x TensorCores get work.
    if (d_pad // bd) * (n_pad // tb) < 2 and n_pad >= 256:
        tb = max(128, ((n_pad // 2) // 128) * 128)
        n_pad = _round_up(n, tb)
    nb_d, nb_n = d_pad // bd, n_pad // tb

    # ---- operand packing (host side, tiny) ----------------------------------------
    # fc1 weight hidden-major with the bias folded in as an extra column, then packed
    # per node block so each grid step reads one contiguous 2-D slab [m1*bd, D+1] whose
    # rows are already hidden-major (row = k*bd + node_local) within the block.
    w1 = fc1_w.astype(f32).reshape(d, m1, d).transpose(1, 0, 2)          # [m1, d, d]
    b1 = fc1_b.astype(f32).reshape(d, m1).T[:, :, None]                  # [m1, d, 1]
    w1r = jnp.concatenate([w1, b1], axis=2)                              # [m1, d, d+1]
    if d_pad > d:
        w1r = jnp.pad(w1r, ((0, 0), (0, d_pad - d), (0, 0)))
    w1r = (w1r.reshape(m1, nb_d, bd, d + 1)
              .transpose(1, 0, 2, 3)
              .reshape(d_pad * m1, d + 1)
              .astype(matmul_dtype))

    # x feature-major with a ones row for the folded fc1 bias.
    x_aug = jnp.concatenate([x.astype(f32).T, jnp.ones((1, n), f32)], axis=0)
    if n_pad > n:
        x_aug = jnp.pad(x_aug, ((0, 0), (0, n_pad - n)))
    x_aug = x_aug.astype(matmul_dtype)                                   # [d+1, n_pad]

    args = [x_aug, w1r]
    layer_dims = []
    m_in = m1
    for w_l, b_l in zip(lc_weights, lc_biases):
        d_l, m_in_l, m_out = w_l.shape
        assert d_l == d and m_in_l == m_in
        layer_dims.append((m_in, m_out))

        w2 = w_l.astype(f32).reshape(d, m_in * m_out)                    # col = m*m_out + o
        b2 = b_l.astype(f32).reshape(d, m_out)
        if d_pad > d:
            w2 = jnp.pad(w2, ((0, d_pad - d), (0, 0)))
            b2 = jnp.pad(b2, ((0, d_pad - d), (0, 0)))
        args += [w2, b2]
        m_in = m_out
    assert m_in == 1, "DagmaMLP requires dims[-1] == 1"

    # ---- grid / specs --------------------------------------------------------------
    # Re-read audit: with node-blocks outer, x is streamed nb_d times and weights once;
    # with batch-blocks outer it is the opposite.  Put the cheaper re-read inside.
    x_bytes = int(args[0].size) * args[0].dtype.itemsize
    w_bytes = sum(int(a.size) * a.dtype.itemsize for a in args[1:])
    node_outer = x_bytes * (nb_d - 1) <= w_bytes * (nb_n - 1)
    if node_outer:
        grid = (nb_d, nb_n)
        nbi = lambda g0, g1: g0   # node-block index
        bbi = lambda g0, g1: g1   # batch-block index
    else:
        grid = (nb_n, nb_d)
        nbi = lambda g0, g1: g1
        bbi = lambda g0, g1: g0

    in_specs = [
        pl.BlockSpec((d + 1, tb), lambda g0, g1: (0, bbi(g0, g1))),
        pl.BlockSpec((m1 * bd, d + 1), lambda g0, g1: (nbi(g0, g1), 0)),
    ]
    for (mi, mo) in layer_dims:
        in_specs.append(pl.BlockSpec((bd, mi * mo), lambda g0, g1: (nbi(g0, g1), 0)))
        in_specs.append(pl.BlockSpec((bd, mo), lambda g0, g1: (nbi(g0, g1), 0)))
    out_specs = pl.BlockSpec((bd, tb), lambda g0, g1: (nbi(g0, g1), bbi(g0, g1)))

    out_t = pl.pallas_call(
        functools.partial(_dagma_kernel, tuple(layer_dims)),
        out_shape=jax.ShapeDtypeStruct((d_pad, n_pad), f32),
        grid=grid,
        in_specs=in_specs,
        out_specs=out_specs,
        compiler_params=pltpu.CompilerParams(
            dimension_semantics=("parallel", "parallel"),
            vmem_limit_bytes=vmem_limit,
        ),
    )(*args)

    if d_pad > d or n_pad > n:
        out_t = out_t[:d, :n]
    # Back to the module's [N, D] layout (feature-major store kept lane-dense in-kernel).
    return out_t.T.astype(x.dtype)


def dagma_mlp_reference(x, fc1_w, fc1_b, lc_weights, lc_biases):
    """Plain-JAX mirror of DagmaMLP.forward for correctness checking."""
    d = x.shape[1]
    m1 = fc1_w.shape[0] // d
    hp = jax.lax.Precision.HIGHEST
    h = jnp.dot(x, fc1_w.T, precision=hp) + fc1_b
    h = h.reshape(-1, d, m1)
    for w_l, b_l in zip(lc_weights, lc_biases):
        h = jax.nn.sigmoid(h)
        h = jnp.einsum('njm,jmo->njo', h, w_l, precision=hp) + b_l[None, :, :]
    return h.squeeze(-1)


if __name__ == "__main__":
    # Canonical DagmaMLP(dims=[d, m1, 1]) at small shapes.
    dims = [8, 16, 1]
    d, m1 = dims[0], dims[1]
    n = 512

    key = jax.random.PRNGKey(0)
    kx, kw1, kb1, kw2, kb2 = jax.random.split(key, 5)

    x = jax.random.normal(kx, (n, d), dtype=jnp.float32)

    # Parameter shapes match the module: fc1 [D*M1, D] / [D*M1], LocallyConnected
    # [D, M1, 1] / [D, 1].  fc1 is zero-init in the module; a small random init is used
    # here so the kernel's hot path is numerically exercised.
    fc1_w = 0.1 * jax.random.normal(kw1, (d * m1, d), dtype=jnp.float32)
    fc1_b = 0.1 * jax.random.normal(kb1, (d * m1,), dtype=jnp.float32)
    bound = 1.0 / math.sqrt(m1)
    lc_weights = [jax.random.uniform(kw2, (d, m1, 1), jnp.float32, -bound, bound)]
    lc_biases = [jax.random.uniform(kb2, (d, 1), jnp.float32, -bound, bound)]

    out = dagma_mlp_forward(x, fc1_w, fc1_b, lc_weights, lc_biases)
    out = jax.block_until_ready(out)

    ref = dagma_mlp_reference(x, fc1_w, fc1_b, lc_weights, lc_biases)
    assert out.shape == (n, d)
    # fc1 runs on the bf16 MXU path with f32 accumulation; tolerance sized accordingly.
    assert jnp.allclose(out, ref, rtol=2e-2, atol=2e-2), "Pallas kernel mismatch vs reference"

    print("KERNEL_OK")
</pallas_src>

<mosaic_0001>
module attributes {stable_mosaic.version = 11 : i64} {
  func.func @_dagma_kernel(%arg0: i32, %arg1: i32, %arg2: memref<9x256xbf16, #tpu.memory_space<vmem>>, %arg3: memref<128x9xbf16, #tpu.memory_space<vmem>>, %arg4: memref<8x16xf32, #tpu.memory_space<vmem>>, %arg5: memref<8x1xf32, #tpu.memory_space<vmem>>, %arg6: memref<8x256xf32, #tpu.memory_space<vmem>>) attributes {dimension_semantics = [#tpu.dimension_semantics<parallel>, #tpu.dimension_semantics<parallel>], iteration_bounds = array<i64: 1, 2>, scalar_prefetch = 0 : i64, scratch_operands = 0 : i64, tpu.core_type = #tpu.core_type<tc>, window_params = [{transform_indices = @transform_0, window_bounds = array<i64: 9, 256>}, {transform_indices = @transform_1, window_bounds = array<i64: 128, 9>}, {transform_indices = @transform_2, window_bounds = array<i64: 8, 16>}, {transform_indices = @transform_3, window_bounds = array<i64: 8, 1>}, {transform_indices = @transform_4, window_bounds = array<i64: 8, 256>}]} {
    %c0 = arith.constant 0 : index
    %c0_0 = arith.constant 0 : index
    %0 = vector.load %arg3[%c0, %c0_0] : memref<128x9xbf16, #tpu.memory_space<vmem>>, vector<128x9xbf16>
    %c0_1 = arith.constant 0 : index
    %c0_2 = arith.constant 0 : index
    %1 = vector.load %arg2[%c0_1, %c0_2] : memref<9x256xbf16, #tpu.memory_space<vmem>>, vector<9x256xbf16>
    %cst = arith.constant dense<0.000000e+00> : vector<128x256xf32>
    %2 = tpu.matmul %0, %1, %cst {dimension_numbers = #tpu.dot_dimension_numbers<[1], [0], [0], [1], [0, 0, 1, 1], [], []>} : vector<128x9xbf16>, vector<9x256xbf16>, vector<128x256xf32> -> vector<128x256xf32>
    %c0_3 = arith.constant 0 : index
    %c0_4 = arith.constant 0 : index
    %3 = vector.load %arg4[%c0_3, %c0_4] : memref<8x16xf32, #tpu.memory_space<vmem>>, vector<8x16xf32>
    %c0_5 = arith.constant 0 : index
    %c0_6 = arith.constant 0 : index
    %4 = vector.load %arg5[%c0_5, %c0_6] : memref<8x1xf32, #tpu.memory_space<vmem>>, vector<8x1xf32>
    %cst_7 = arith.constant 5.000000e-01 : f32
    %5 = vector.broadcast %cst_7 : f32 to vector<128x256xf32>
    %6 = arith.mulf %5, %2 : vector<128x256xf32>
    %7 = math.tanh %6 : vector<128x256xf32>
    %cst_8 = arith.constant 5.000000e-01 : f32
    %8 = vector.broadcast %cst_8 : f32 to vector<128x256xf32>
    %9 = arith.mulf %8, %7 : vector<128x256xf32>
    %cst_9 = arith.constant 5.000000e-01 : f32
    %10 = vector.broadcast %cst_9 : f32 to vector<128x256xf32>
    %11 = arith.addf %9, %10 : vector<128x256xf32>
    %12 = vector.extract_strided_slice %11 {offsets = [0, 0], sizes = [8, 256], strides = [1, 1]} : vector<128x256xf32> to vector<8x256xf32>
    %13 = vector.extract_strided_slice %3 {offsets = [0, 0], sizes = [8, 1], strides = [1, 1]} : vector<8x16xf32> to vector<8x1xf32>
    %14 = vector.broadcast %13 : vector<8x1xf32> to vector<8x256xf32>
    %15 = arith.mulf %12, %14 : vector<8x256xf32>
    %16 = vector.extract_strided_slice %11 {offsets = [8, 0], sizes = [8, 256], strides = [1, 1]} : vector<128x256xf32> to vector<8x256xf32>
    %17 = vector.extract_strided_slice %3 {offsets = [0, 1], sizes = [8, 1], strides = [1, 1]} : vector<8x16xf32> to vector<8x1xf32>
    %18 = vector.broadcast %17 : vector<8x1xf32> to vector<8x256xf32>
    %19 = arith.mulf %16, %18 : vector<8x256xf32>
    %20 = arith.addf %15, %19 : vector<8x256xf32>
    %21 = vector.extract_strided_slice %11 {offsets = [16, 0], sizes = [8, 256], strides = [1, 1]} : vector<128x256xf32> to vector<8x256xf32>
    %22 = vector.extract_strided_slice %3 {offsets = [0, 2], sizes = [8, 1], strides = [1, 1]} : vector<8x16xf32> to vector<8x1xf32>
    %23 = vector.broadcast %22 : vector<8x1xf32> to vector<8x256xf32>
    %24 = arith.mulf %21, %23 : vector<8x256xf32>
    %25 = arith.addf %20, %24 : vector<8x256xf32>
    %26 = vector.extract_strided_slice %11 {offsets = [24, 0], sizes = [8, 256], strides = [1, 1]} : vector<128x256xf32> to vector<8x256xf32>
    %27 = vector.extract_strided_slice %3 {offsets = [0, 3], sizes = [8, 1], strides = [1, 1]} : vector<8x16xf32> to vector<8x1xf32>
    %28 = vector.broadcast %27 : vector<8x1xf32> to vector<8x256xf32>
    %29 = arith.mulf %26, %28 : vector<8x256xf32>
    %30 = arith.addf %25, %29 : vector<8x256xf32>
    %31 = vector.extract_strided_slice %11 {offsets = [32, 0], sizes = [8, 256], strides = [1, 1]} : vector<128x256xf32> to vector<8x256xf32>
    %32 = vector.extract_strided_slice %3 {offsets = [0, 4], sizes = [8, 1], strides = [1, 1]} : vector<8x16xf32> to vector<8x1xf32>
    %33 = vector.broadcast %32 : vector<8x1xf32> to vector<8x256xf32>
    %34 = arith.mulf %31, %33 : vector<8x256xf32>
    %35 = arith.addf %30, %34 : vector<8x256xf32>
    %36 = vector.extract_strided_slice %11 {offsets = [40, 0], sizes = [8, 256], strides = [1, 1]} : vector<128x256xf32> to vector<8x256xf32>
    %37 = vector.extract_strided_slice %3 {offsets = [0, 5], sizes = [8, 1], strides = [1, 1]} : vector<8x16xf32> to vector<8x1xf32>
    %38 = vector.broadcast %37 : vector<8x1xf32> to vector<8x256xf32>
    %39 = arith.mulf %36, %38 : vector<8x256xf32>
    %40 = arith.addf %35, %39 : vector<8x256xf32>
    %41 = vector.extract_strided_slice %11 {offsets = [48, 0], sizes = [8, 256], strides = [1, 1]} : vector<128x256xf32> to vector<8x256xf32>
    %42 = vector.extract_strided_slice %3 {offsets = [0, 6], sizes = [8, 1], strides = [1, 1]} : vector<8x16xf32> to vector<8x1xf32>
    %43 = vector.broadcast %42 : vector<8x1xf32> to vector<8x256xf32>
    %44 = arith.mulf %41, %43 : vector<8x256xf32>
    %45 = arith.addf %40, %44 : vector<8x256xf32>
    %46 = vector.extract_strided_slice %11 {offsets = [56, 0], sizes = [8, 256], strides = [1, 1]} : vector<128x256xf32> to vector<8x256xf32>
    %47 = vector.extract_strided_slice %3 {offsets = [0, 7], sizes = [8, 1], strides = [1, 1]} : vector<8x16xf32> to vector<8x1xf32>
    %48 = vector.broadcast %47 : vector<8x1xf32> to vector<8x256xf32>
    %49 = arith.mulf %46, %48 : vector<8x256xf32>
    %50 = arith.addf %45, %49 : vector<8x256xf32>
    %51 = vector.extract_strided_slice %11 {offsets = [64, 0], sizes = [8, 256], strides = [1, 1]} : vector<128x256xf32> to vector<8x256xf32>
    %52 = vector.extract_strided_slice %3 {offsets = [0, 8], sizes = [8, 1], strides = [1, 1]} : vector<8x16xf32> to vector<8x1xf32>
    %53 = vector.broadcast %52 : vector<8x1xf32> to vector<8x256xf32>
    %54 = arith.mulf %51, %53 : vector<8x256xf32>
    %55 = arith.addf %50, %54 : vector<8x256xf32>
    %56 = vector.extract_strided_slice %11 {offsets = [72, 0], sizes = [8, 256], strides = [1, 1]} : vector<128x256xf32> to vector<8x256xf32>
    %57 = vector.extract_strided_slice %3 {offsets = [0, 9], sizes = [8, 1], strides = [1, 1]} : vector<8x16xf32> to vector<8x1xf32>
    %58 = vector.broadcast %57 : vector<8x1xf32> to vector<8x256xf32>
    %59 = arith.mulf %56, %58 : vector<8x256xf32>
    %60 = arith.addf %55, %59 : vector<8x256xf32>
    %61 = vector.extract_strided_slice %11 {offsets = [80, 0], sizes = [8, 256], strides = [1, 1]} : vector<128x256xf32> to vector<8x256xf32>
    %62 = vector.extract_strided_slice %3 {offsets = [0, 10], sizes = [8, 1], strides = [1, 1]} : vector<8x16xf32> to vector<8x1xf32>
    %63 = vector.broadcast %62 : vector<8x1xf32> to vector<8x256xf32>
    %64 = arith.mulf %61, %63 : vector<8x256xf32>
    %65 = arith.addf %60, %64 : vector<8x256xf32>
    %66 = vector.extract_strided_slice %11 {offsets = [88, 0], sizes = [8, 256], strides = [1, 1]} : vector<128x256xf32> to vector<8x256xf32>
    %67 = vector.extract_strided_slice %3 {offsets = [0, 11], sizes = [8, 1], strides = [1, 1]} : vector<8x16xf32> to vector<8x1xf32>
    %68 = vector.broadcast %67 : vector<8x1xf32> to vector<8x256xf32>
    %69 = arith.mulf %66, %68 : vector<8x256xf32>
    %70 = arith.addf %65, %69 : vector<8x256xf32>
    %71 = vector.extract_strided_slice %11 {offsets = [96, 0], sizes = [8, 256], strides = [1, 1]} : vector<128x256xf32> to vector<8x256xf32>
    %72 = vector.extract_strided_slice %3 {offsets = [0, 12], sizes = [8, 1], strides = [1, 1]} : vector<8x16xf32> to vector<8x1xf32>
    %73 = vector.broadcast %72 : vector<8x1xf32> to vector<8x256xf32>
    %74 = arith.mulf %71, %73 : vector<8x256xf32>
    %75 = arith.addf %70, %74 : vector<8x256xf32>
    %76 = vector.extract_strided_slice %11 {offsets = [104, 0], sizes = [8, 256], strides = [1, 1]} : vector<128x256xf32> to vector<8x256xf32>
    %77 = vector.extract_strided_slice %3 {offsets = [0, 13], sizes = [8, 1], strides = [1, 1]} : vector<8x16xf32> to vector<8x1xf32>
    %78 = vector.broadcast %77 : vector<8x1xf32> to vector<8x256xf32>
    %79 = arith.mulf %76, %78 : vector<8x256xf32>
    %80 = arith.addf %75, %79 : vector<8x256xf32>
    %81 = vector.extract_strided_slice %11 {offsets = [112, 0], sizes = [8, 256], strides = [1, 1]} : vector<128x256xf32> to vector<8x256xf32>
    %82 = vector.extract_strided_slice %3 {offsets = [0, 14], sizes = [8, 1], strides = [1, 1]} : vector<8x16xf32> to vector<8x1xf32>
    %83 = vector.broadcast %82 : vector<8x1xf32> to vector<8x256xf32>
    %84 = arith.mulf %81, %83 : vector<8x256xf32>
    %85 = arith.addf %80, %84 : vector<8x256xf32>
    %86 = vector.extract_strided_slice %11 {offsets = [120, 0], sizes = [8, 256], strides = [1, 1]} : vector<128x256xf32> to vector<8x256xf32>
    %87 = vector.extract_strided_slice %3 {offsets = [0, 15], sizes = [8, 1], strides = [1, 1]} : vector<8x16xf32> to vector<8x1xf32>
    %88 = vector.broadcast %87 : vector<8x1xf32> to vector<8x256xf32>
    %89 = arith.mulf %86, %88 : vector<8x256xf32>
    %90 = arith.addf %85, %89 : vector<8x256xf32>
    %91 = vector.broadcast %4 : vector<8x1xf32> to vector<8x256xf32>
    %92 = arith.addf %90, %91 : vector<8x256xf32>
    %c0_10 = arith.constant 0 : index
    %c0_11 = arith.constant 0 : index
    %93 = vector.load %arg6[%c0_10, %c0_11] : memref<8x256xf32, #tpu.memory_space<vmem>>, vector<8x256xf32>
    tpu.vector_store %arg6[%c0_10, %c0_11], %92 {strides = array<i32>} : memref<8x256xf32, #tpu.memory_space<vmem>>, vector<8x256xf32>,
    return
  }
  func.func @transform_0(%arg0: i32, %arg1: i32) -> (i32, i32) {
    %c0_i32 = arith.constant 0 : i32
    %c0_i32_0 = arith.constant 0 : i32
    return %c0_i32, %arg1 : i32, i32
  }
  func.func @transform_1(%arg0: i32, %arg1: i32) -> (i32, i32) {
    %c0_i32 = arith.constant 0 : i32
    %c0_i32_0 = arith.constant 0 : i32
    return %arg0, %c0_i32 : i32, i32
  }
  func.func @transform_2(%arg0: i32, %arg1: i32) -> (i32, i32) {
    %c0_i32 = arith.constant 0 : i32
    %c0_i32_0 = arith.constant 0 : i32
    return %arg0, %c0_i32 : i32, i32
  }
  func.func @transform_3(%arg0: i32, %arg1: i32) -> (i32, i32) {
    %c0_i32 = arith.constant 0 : i32
    %c0_i32_0 = arith.constant 0 : i32
    return %arg0, %c0_i32 : i32, i32
  }
  func.func @transform_4(%arg0: i32, %arg1: i32) -> (i32, i32) {
    %c0_i32 = arith.constant 0 : i32
    return %arg0, %arg1 : i32, i32
  }
}

</mosaic_0001>

<bundles_post_ra>
// kernel: dagma_mlp_forward.1
= control target key start
LH: loop header
LB: loop body
LE: loop exit
PB: predicated region body
PF: predicated region fallthrough
CT: control target
= control target key end

     0   :  { %9 = vsyncpa [#allocation4], 0  ;;  %s1500_s0 = inlined_call_operand.vmem [shape: bf16[9,512], index: 0, kind: input, shape index: {}]   ;;  %s1501_s1 = inlined_call_operand.vmem [shape: bf16[128,9], index: 1, kind: input, shape index: {}]   ;;  %s1502_s2 = inlined_call_operand.vmem [shape: f32[8,16], index: 2, kind: input, shape index: {}]   ;;  %s1503_s3 = inlined_call_operand.vmem [shape: f32[8,1], index: 3, kind: input, shape index: {}]   ;;  %s1504_s4 = inlined_call_operand.hbm [shape: f32[8,512], index: 4, kind: output, shape index: {}]  }
   0x1   :  { %11 = vsyncpa [#allocation4 + $0x1], 0  ;;  %s1254_s15 = smov 0   ;;  %s1256_s16 = smov 0  }
   0x2   :  { %s1258_s17 = smov 0   ;;  %s1260_s18 = smov 0  }
   0x3   :  { %s1262_s19 = smov 0   ;;  %s1264_s20 = smov 0  }
   0x4 LB: > { %s926_s21 = sadd.s32 4294967295, %s1209_s20   ;;  %s927_s22 = sadd.s32 4294967294, %s1209_s20   ;;  %s1209_s20 = sphi %s1264_s20, %s17_s20   ;;  %s1205_s19 = sphi %s1262_s19, %s1511_s19   ;;  %s1201_s18 = sphi %s1260_s18, %s1510_s18   ;;  %s1197_s17 = sphi %s1258_s17, %s1509_s17   ;;  %s1193_s16 = sphi %s1256_s16, %s1508_s16   ;;  %s1189_s15 = sphi %s1254_s15, %s1507_s15  }
   0x5   : > { %s26_s23 = sadd.s32 1, %s1205_s19  ;;  %s36_s24 = sadd.s32 1, %s1197_s17 }
   0x6   : > { %p27_p0 = scmp.ge.s32.totalorder %s26_s23, 2  ;;  %p43_p1 = scmp.ne.s32.totalorder %s1197_s17, %s1193_s16 }
   0x7   : > { %p44_p2 = scmp.eq.s32.totalorder %s1209_s20, 0  ;;  %p153_p3 = scmp.eq.s32.totalorder %s926_s21, 1 }
   0x8   : > { %s1513_s23 = smov (%p27_p0, %s26_s23), 0  ;;  %p158_p6 = scmp.ne.s32.totalorder %s1193_s16, %s1189_s15 }
   0x9   : > { %p45_p4 = por %p44_p2, %p43_p1  ;;  %p1293_p5 = por %p153_p3, %p43_p1 }
   0xa   : > { %s33_s26 = ssub.s32 %s1205_s19, %s1513_s23  ;;  %p159_p8 = scmp.eq.s32.totalorder %s927_s22, 1 }
   0xb   : > { %p34_p7 = scmp.eq.s32.totalorder %s33_s26, 0  ;;  %p932_p10 = scmp.ge.s32.totalorder %s1209_s20, 2 }
   0xc   : > { %p1304_p9 = por %p159_p8, %p158_p6 }
   0xd   : > { %s1302_s27 = scalar_select %p34_p7, %s1197_s17, %s36_s24  }
   0xe   : > { %198 = sbr.rel (%p932_p10) target bundleno = 28 (0x1c), region = 28 }
  0x15   : > { %201 = sbr.rel (!%p45_p4) target bundleno = 28 (0x1c), region = 32  ;;  %s203_s29 = sand.u32 (%p45_p4), 1, %s1197_s17  }
  0x16   : > { %s962_s30 = sshll.u32 (%p45_p4), %s1205_s19, 3  ;;  %s933_s5 = sshll.u32 (%p45_p4), %s203_s29, 4 }
  0x17   : > { %s208_s8 = scalar_lea.vmem (%p45_p4), %s1500_s0, %s962_s30  ;;  %s205_s9 = scalar_lea.vmem (%p45_p4), [#allocation2], %s933_s5 }
  0x18   : > { %v238_v0 = vld [vmem:[%s208_s8] sm:$0xff] (%p45_p4)  ;;  %v240_v1 = vld [vmem:[%s208_s8 + $0x10] sm:$0xff] (%p45_p4) }
  0x19   : > { %239 = vst [vmem:[%s205_s9] sm:$0xff] (%p45_p4), %v238_v0  ;;  %241 = vst [vmem:[%s205_s9 + $0x8] sm:$0xff] (%p45_p4), %v240_v1 }
  0x1c PF: > { %p936_p11 = scmp.ge.s32.totalorder %s1209_s20, 1  ;;  %p246_p12 = scmp.lt.s32.totalorder %s1209_s20, 3 }
  0x1e   : > { %p247_p13 = pnand %p936_p11, %p246_p12 }
  0x1f   : > { %s253_s10 = sand.u32 (!%p247_p13), 1, %s1193_s16   ;;  %vm399_vm0 = vcmask (!%p247_p13), 1043456   ;;  %vm400_vm1 = vcmask (!%p247_p13), 1044480   ;;  %v1211_v2 = vmov (!%p247_p13), 65535   ;;  %v1212_v4 = vmov (!%p247_p13), 0   ;;  %v1059_v10 = vld [vmem:[%s1501_s1] sm:$0xff] (!%p247_p13)  }
  0x20   : > { %250 = sbr.rel (%p247_p13) target bundleno = 335 (0x14f), region = 70  ;;  %s1321_s11 = sshll.u32 (!%p247_p13), %s253_s10, 4  ;;  %v401_v3 = vsel (!%p247_p13), %vm399_vm0, 4294967295, %v1211_v2  ;;  %441 = vmatprep.mubr.bf16.mxu0 (!%p247_p13), %v1212_v4  ;;  %481 = vmatprep.mubr.bf16.mxu1 (!%p247_p13), %v1212_v4  ;;  %v1061_v11 = vld [vmem:[%s1501_s1 + $0x20] sm:$0xff] (!%p247_p13)   ;;  %vm374_vm2 = vcmask (!%p247_p13), 72704   ;;  %v1213_v12 = vmov (!%p247_p13), 2  }
  0x21   : > { %v402_v5 = vsel (!%p247_p13), %vm400_vm1, %v401_v3, 0  ;;  %1038 = vset.pattern.permute.xlu0 (!%p247_p13), %v1212_v4  ;;  %s255_s12 = scalar_lea.vmem (!%p247_p13), [#allocation2], %s1321_s11  ;;  %1040 = vset.pattern.permute.xlu1 (!%p247_p13), %v1213_v12  ;;  %v1336_v13 = vld [vmem:[%s1502_s2] sm:$0xff] (!%p247_p13)  ;;  %v1060_v14 = vld [vmem:[%s1501_s1 + $0x8] sm:$0xff] (!%p247_p13)   ;;  %v1214_v16 = vmov (!%p247_p13), 3   ;;  %v1215_v17 = vmov (!%p247_p13), 1  }
  0x22   : > { %v1056_v6 = vld [vmem:[%s255_s12 + $0x4] ss:$8 sps:$4 sm:$0x1f] (!%p247_p13)   ;;  %v1058_v7 = vld [vmem:[%s255_s12] ss:$8 sps:$4 sm:$0x1f] (!%p247_p13)   ;;  %668 = vperm.xlu1 (!%p247_p13), %1040, %v1336_v13   ;;  %654 = vperm.xlu0 (!%p247_p13), %1038, %v1336_v13  }
  0x23   : > { %v407_v8 = vand.u32 (!%p247_p13), %v1056_v6, %v402_v5  ;;  %v404_v9 = vand.u32 (!%p247_p13), %v1058_v7, %v402_v5  ;;  %v1063_v15 = vld [vmem:[%s1501_s1 + $0x28] sm:$0xff] (!%p247_p13)   ;;  %v1216_v18 = vmov (!%p247_p13), 4   ;;  %v1217_v19 = vmov (!%p247_p13), 5   ;;  %v1062_v20 = vld [vmem:[%s1501_s1 + $0x10] sm:$0xff] (!%p247_p13)   ;;  %v1064_v24 = vld [vmem:[%s1501_s1 + $0x18] sm:$0xff] (!%p247_p13)   ;;  %s963_s29 = sshll.u32 (!%p247_p13), %s1201_s18, 8 }
  0x24   : > { %v1065_v21 = vld [vmem:[%s1501_s1 + $0x30] sm:$0xff] (!%p247_p13)   ;;  %v1218_v22 = vmov (!%p247_p13), 6   ;;  %v1219_v23 = vmov (!%p247_p13), 8   ;;  %v1066_v25 = vld [vmem:[%s1501_s1 + $0x38] sm:$0xff] (!%p247_p13)   ;;  %v1220_v26 = vmov (!%p247_p13), 7   ;;  %v1221_v27 = vmov (!%p247_p13), 11   ;;  %s1450_s8 = scalar_lea.hbm (!%p247_p13), %s1504_s4, %s963_s29 }
  0x25   : > { %409 = vmatprep.subr.bf16.mxu0 (!%p247_p13), %v407_v8  ;;  %964 = vmatprep.subr.bf16.mxu1 (!%p247_p13), %v407_v8  ;;  %v1222_v28 = vmov (!%p247_p13), 9   ;;  %v1223_v29 = vmov (!%p247_p13), 14   ;;  %v1224_v30 = vmov (!%p247_p13), 10   ;;  %v1225_v31 = vmov (!%p247_p13), 12   ;;  %v523_v34 = vld [vmem:[%s1503_s3] sm:$0xff] (!%p247_p13)  ;;  %s290_s30 = scalar_lea.vmem (!%p247_p13), [#allocation3], %s1321_s11 }
  0x26   : > { %410 = vmatpush1.bf16.msra.mxu0 (!%p247_p13), %v404_v9  ;;  %965 = vmatpush1.bf16.msra.mxu1 (!%p247_p13), %v404_v9  ;;  %v1226_v32 = vmov (!%p247_p13), 13   ;;  %v1227_v33 = vmov (!%p247_p13), 15   ;;  %s805_s5 = sshll.u32 (!%p247_p13), %s290_s30, 4  ;;  %s789_s9 = scalar_lea.sflag (!%p247_p13), [#allocation4], %s253_s10  ;;  %s1452_s5 = int_to_ptr.vmem [resolvable:$true] %s805_s5 }
  0x27   : > { %1041 = vset.pattern.permute.xlu1 %v1214_v16  ;;  %1039 = vset.pattern.permute.xlu0 %v1215_v17  ;;  %s1131_s18 = scalar_lea.vmem %s1452_s5, 256  ;;  %s1228_s11 = smov [#allocation3]  }
  0x28   : > { %676 = vperm.xlu1 %1041, %v1336_v13   ;;  %660 = vperm.xlu0 %1039, %v1336_v13   ;;  %p1132_p0 = scmp.ne.s32.totalorder %s1452_s5, %s1131_s18  ;;  %s1135_s12 = sshll.u32 %s1228_s11, 4  ;;  %s1136_s12 = int_to_ptr.vmem [resolvable:$false] %s1135_s12 }
  0x29   : > { %949 = vmatmul.mubr.msk.bf16.vlgmr.msra.gmra.mrb[0].mxu0 %vm374_vm2, %v1059_v10  ;;  %953 = vmatmul.mubr.msk.bf16.vlgmr.msra.gmra.mrb[0].mxu1 %vm374_vm2, %v1061_v11  ;;  %s1137_s13 = scalar_lea.vmem %s1136_s12, 512  ;;  %p1138_p3 = scmp.lt.s32.totalorder %s1452_s5, %s1136_s12 }
  0x2a   : > { %451 = vmatprep.mubr.bf16.mxu0 %v1212_v4  ;;  %491 = vmatprep.mubr.bf16.mxu1 %v1212_v4  ;;  %p1133_p1 = pnand %p1132_p0, %p1293_p5  ;;  %p1139_p4 = scmp.lt.s32.totalorder %s1137_s13, %s1131_s18 }
  0x2c   : > { %1042 = vset.pattern.permute.xlu1 %v1216_v18  ;;  %1043 = vset.pattern.permute.xlu0 %v1217_v19  ;;  %p1134_p2 = pneg %p1133_p1  ;;  %p1140_p6 = por %p1139_p4, %p1138_p3 }
  0x2d   : > { %684 = vperm.xlu1 %1042, %v1336_v13   ;;  %692 = vperm.xlu0 %1043, %v1336_v13  }
  0x2e   : > { %p1141_p7 = pnand %p1140_p6, %p1134_p2 }
  0x31   : > { %950 = vmatmul.mubr.msk.bf16.gmra.mrb[4].mxu0 %vm374_vm2, %v1060_v14  ;;  %954 = vmatmul.mubr.msk.bf16.gmra.mrb[4].mxu1 %vm374_vm2, %v1063_v15 }
  0x32   : > { %461 = vmatprep.mubr.bf16.mxu0 %v1212_v4  ;;  %501 = vmatprep.mubr.bf16.mxu1 %v1212_v4 }
  0x33   : > { %1044 = vset.pattern.permute.xlu1 %v1218_v22  ;;  %1046 = vset.pattern.permute.xlu0 %v1219_v23 }
  0x34   : > { %700 = vperm.xlu1 %1044, %v1336_v13   ;;  %716 = vperm.xlu0 %1046, %v1336_v13  }
  0x38   : > { %1045 = vset.pattern.permute.xlu1 %v1220_v26  ;;  %1049 = vset.pattern.permute.xlu0 %v1221_v27 }
  0x39   : > { %951 = vmatmul.mubr.msk.bf16.gmra.mrb[8].mxu0 %vm374_vm2, %v1062_v20  ;;  %955 = vmatmul.mubr.msk.bf16.gmra.mrb[8].mxu1 %vm374_vm2, %v1065_v21 }
  0x3a   : > { %471 = vmatprep.mubr.bf16.mxu0 %v1212_v4  ;;  %511 = vmatprep.mubr.bf16.mxu1 %v1212_v4 }
  0x3b   : > { %708 = vperm.xlu1 %1045, %v1336_v13   ;;  %740 = vperm.xlu0 %1049, %v1336_v13  }
  0x3f   : > { %1047 = vset.pattern.permute.xlu1 %v1222_v28  ;;  %1052 = vset.pattern.permute.xlu0 %v1223_v29 }
  0x40   : > { %724 = vperm.xlu1 %1047, %v1336_v13   ;;  %764 = vperm.xlu0 %1052, %v1336_v13  }
  0x41   : > { %952 = vmatmul.mubr.msk.bf16.gmra.mrb[12].mxu0 %vm374_vm2, %v1064_v24  ;;  %956 = vmatmul.mubr.msk.bf16.gmra.mrb[12].mxu1 %vm374_vm2, %v1066_v25 }
  0x44   : > { %1048 = vset.pattern.permute.xlu1 %v1224_v30  ;;  %1055 = vset.pattern.permute.xlu0 %v1212_v4 }
  0x45   : > { %732 = vperm.xlu1 %1048, %v1336_v13  }
  0x49   : > { %1050 = vset.pattern.permute.xlu1 %v1225_v31 }
  0x4a   : > { %748 = vperm.xlu1 %1050, %v1336_v13  }
  0x4e   : > { %1051 = vset.pattern.permute.xlu1 %v1226_v32 }
  0x4f   : > { %756 = vperm.xlu1 %1051, %v1336_v13  }
  0x53   : > { %1053 = vset.pattern.permute.xlu1 %v1227_v33 }
  0x54   : > { %772 = vperm.xlu1 %1053, %v1336_v13  }
  0x58   : > { %1054 = vset.pattern.permute.xlu1 %v1212_v4 }
  0x59   : > { %781 = vperm.xlu1 %1054, %v523_v34  }
  0xa1   : > { %v1391_v35 = vpop.permute.xlu1 %668  ;;  %v1393_v48 = vpop.permute.xlu0 %654 }
  0xa7   : > { %v1395_v49 = vpop.permute.xlu1 %676  ;;  %v661_v7 = vpop.permute.xlu0 %660 }
  0xac   : > { %v1397_v8 = vpop.permute.xlu1 %684 }
  0xfc   : > { %v443_v36 = vpop.f32.mrb[0].mxu0  ;;  %v483_v37 = vpop.f32.mrb[0].mxu1 }
  0xfd   : > { %v524_v38 = vmul.f32 0.5, %v443_v36  ;;  %v445_v39 = vpop.f32.mrb[1].mxu0  ;;  %v485_v40 = vpop.f32.mrb[1].mxu1  ;;  %v540_v60 = vmul.f32 0.5, %v483_v37 }
  0xfe   : > { %v525_v41 = vmul.f32 0.5, %v445_v39  ;;  %v447_v42 = vpop.f32.mrb[2].mxu0  ;;  %v487_v43 = vpop.f32.mrb[2].mxu1  ;;  %v541_v63 = vmul.f32 0.5, %v485_v40 }
  0xff   : > { %1067 = vtanh.f32 %v524_v38  ;;  %v526_v44 = vmul.f32 0.5, %v447_v42  ;;  %v449_v45 = vpop.f32.mrb[3].mxu0  ;;  %v489_v46 = vpop.f32.mrb[3].mxu1  ;;  %v542_v1 = vmul.f32 0.5, %v487_v43 }
 0x100   : > { %1069 = vtanh.f32 %v525_v41  ;;  %v527_v47 = vmul.f32 0.5, %v449_v45  ;;  %v543_v4 = vmul.f32 0.5, %v489_v46  ;;  %v1409_v43 = vpop.permute.xlu1 %700 }
 0x101   : > { %1071 = vtanh.f32 %v526_v44 }
 0x102   : > { %1073 = vtanh.f32 %v527_v47 }
 0x104   : > { %v453_v50 = vpop.f32.mrb[4].mxu0  ;;  %v493_v51 = vpop.f32.mrb[4].mxu1 }
 0x105   : > { %v528_v52 = vmul.f32 0.5, %v453_v50  ;;  %v455_v53 = vpop.f32.mrb[5].mxu0  ;;  %v495_v54 = vpop.f32.mrb[5].mxu1  ;;  %v544_v25 = vmul.f32 0.5, %v493_v51 }
 0x106   : > { %v529_v55 = vmul.f32 0.5, %v455_v53  ;;  %v457_v56 = vpop.f32.mrb[6].mxu0  ;;  %v497_v57 = vpop.f32.mrb[6].mxu1  ;;  %v545_v32 = vmul.f32 0.5, %v495_v54 }
 0x107   : > { %1075 = vtanh.f32 %v528_v52  ;;  %v530_v58 = vmul.f32 0.5, %v457_v56  ;;  %v459_v59 = vpop.f32.mrb[7].mxu0  ;;  %v499_v61 = vpop.f32.mrb[7].mxu1  ;;  %v546_v33 = vmul.f32 0.5, %v497_v57 }
 0x108   : > { %1077 = vtanh.f32 %v529_v55  ;;  %v531_v62 = vmul.f32 0.5, %v459_v59  ;;  %v547_v42 = vmul.f32 0.5, %v499_v61 }
 0x109   : > { %v1068_v0 = vpop.eup %1067  ;;  %1079 = vtanh.f32 %v530_v58 }
 0x10a   : > { %v1070_v2 = vpop.eup %1069  ;;  %v588_v3 = vmul.f32 0.5, %v1068_v0  ;;  %1081 = vtanh.f32 %v531_v62 }
 0x10b   : > { %v1072_v5 = vpop.eup %1071  ;;  %v589_v6 = vmul.f32 0.5, %v1070_v2  ;;  %1083 = vtanh.f32 %v540_v60 }
 0x10c   : > { %v1074_v9 = vpop.eup %1073  ;;  %v590_v10 = vmul.f32 0.5, %v1072_v5  ;;  %1085 = vtanh.f32 %v541_v63  ;;  %v620_v11 = vadd.f32 0.5, %v588_v3  ;;  %v463_v12 = vpop.f32.mrb[8].mxu0 }
 0x10d   : > { %v1399_v13 = vpop.f32.mrb[8].mxu1  ;;  %v591_v14 = vmul.f32 0.5, %v1074_v9  ;;  %1087 = vtanh.f32 %v542_v1  ;;  %v532_v15 = vmul.f32 0.5, %v463_v12  ;;  %v465_v16 = vpop.f32.mrb[9].mxu0  ;;  %v621_v18 = vadd.f32 0.5, %v589_v6 }
 0x10e   : > { %v1401_v17 = vpop.f32.mrb[9].mxu1  ;;  %1089 = vtanh.f32 %v543_v4  ;;  %v533_v19 = vmul.f32 0.5, %v465_v16  ;;  %v467_v20 = vpop.f32.mrb[10].mxu0  ;;  %v622_v21 = vadd.f32 0.5, %v590_v10  ;;  %v657_v27 = vmul.f32 %v1393_v48, %v620_v11 }
 0x10f   : > { %v1403_v22 = vpop.f32.mrb[10].mxu1  ;;  %1091 = vtanh.f32 %v532_v15  ;;  %v534_v23 = vmul.f32 0.5, %v467_v20  ;;  %v469_v24 = vpop.f32.mrb[11].mxu0  ;;  %v623_v28 = vadd.f32 0.5, %v591_v14  ;;  %v658_v37 = vmul.f32 %v1393_v48, %v621_v18 }
 0x110   : > { %v1405_v26 = vpop.f32.mrb[11].mxu1  ;;  %1093 = vtanh.f32 %v533_v19  ;;  %v663_v29 = vmul.f32 %v661_v7, %v622_v21  ;;  %v535_v31 = vmul.f32 0.5, %v469_v24  ;;  %v549_v18 = vmul.f32 0.5, %v1401_v17 }
 0x111   : > { %v1076_v30 = vpop.eup %1075  ;;  %1095 = vtanh.f32 %v534_v23  ;;  %v664_v38 = vmul.f32 %v661_v7, %v623_v28  ;;  %v548_v7 = vmul.f32 0.5, %v1399_v13  ;;  %v550_v13 = vmul.f32 0.5, %v1403_v22 }
 0x112   : > { %v1078_v34 = vpop.eup %1077  ;;  %v592_v36 = vmul.f32 0.5, %v1076_v30  ;;  %v665_v39 = vadd.f32 %v663_v29, %v657_v27  ;;  %1097 = vtanh.f32 %v535_v31  ;;  %v1430_v27 = vpop.permute.xlu1 %708  ;;  %v551_v28 = vmul.f32 0.5, %v1405_v26 }
 0x113   : > { %v1080_v40 = vpop.eup %1079  ;;  %v593_v41 = vmul.f32 0.5, %v1078_v34  ;;  %v666_v47 = vadd.f32 %v664_v38, %v658_v37  ;;  %1099 = vtanh.f32 %v544_v25  ;;  %v693_v34 = vpop.permute.xlu0 %692 }
 0x114   : > { %v1082_v44 = vpop.eup %1081  ;;  %v594_v45 = vmul.f32 0.5, %v1080_v40  ;;  %v624_v46 = vadd.f32 0.5, %v592_v36  ;;  %v473_v50 = vpop.f32.mrb[12].mxu0  ;;  %1101 = vtanh.f32 %v545_v32 }
 0x115   : > { %v1411_v51 = vpop.f32.mrb[12].mxu1  ;;  %v1413_v52 = vpop.eup %1083  ;;  %v595_v53 = vmul.f32 0.5, %v1082_v44  ;;  %v625_v48 = vadd.f32 0.5, %v593_v41  ;;  %v536_v54 = vmul.f32 0.5, %v473_v50  ;;  %1103 = vtanh.f32 %v546_v33 }
 0x116   : > { %v475_v55 = vpop.f32.mrb[13].mxu0  ;;  %v1415_v56 = vpop.f32.mrb[13].mxu1  ;;  %v671_v58 = vmul.f32 %v1391_v35, %v624_v46  ;;  %v626_v59 = vadd.f32 0.5, %v594_v45  ;;  %v552_v26 = vmul.f32 0.5, %v1411_v51 }
 0x117   : > { %v1417_v57 = vpop.eup %1085  ;;  %v537_v60 = vmul.f32 0.5, %v475_v55  ;;  %v477_v61 = vpop.f32.mrb[14].mxu0  ;;  %v672_v0 = vmul.f32 %v1391_v35, %v625_v48  ;;  %v627_v1 = vadd.f32 0.5, %v595_v53  ;;  %1105 = vtanh.f32 %v536_v54 }
 0x118   : > { %v517_v62 = vpop.f32.mrb[14].mxu1  ;;  %v1420_v63 = vpop.eup %1087  ;;  %v679_v5 = vmul.f32 %v1395_v49, %v626_v59  ;;  %v673_v6 = vadd.f32 %v671_v58, %v665_v39  ;;  %v538_v12 = vmul.f32 0.5, %v477_v61  ;;  %v553_v46 = vmul.f32 0.5, %v1415_v56 }
 0x119   : > { %v479_v2 = vpop.f32.mrb[15].mxu0  ;;  %v519_v3 = vpop.f32.mrb[15].mxu1  ;;  %1107 = vtanh.f32 %v537_v60  ;;  %v680_v10 = vmul.f32 %v1395_v49, %v627_v1  ;;  %v674_v11 = vadd.f32 %v672_v0, %v666_v47  ;;  %v604_v54 = vmul.f32 0.5, %v1413_v52 }
 0x11a   : > { %v1423_v4 = vpop.eup %1089  ;;  %v539_v14 = vmul.f32 0.5, %v479_v2  ;;  %v681_v16 = vadd.f32 %v679_v5, %v673_v6  ;;  %1109 = vtanh.f32 %v547_v42  ;;  %v725_v50 = vpop.permute.xlu1 %724  ;;  %v555_v53 = vmul.f32 0.5, %v519_v3 }
 0x11b   : > { %v1092_v9 = vpop.eup %1091  ;;  %v682_v21 = vadd.f32 %v680_v10, %v674_v11  ;;  %1111 = vtanh.f32 %v538_v12  ;;  %v605_v51 = vmul.f32 0.5, %v1417_v57  ;;  %v606_v60 = vmul.f32 0.5, %v1420_v63 }
 0x11c   : > { %v1094_v15 = vpop.eup %1093  ;;  %v596_v35 = vmul.f32 0.5, %v1092_v9  ;;  %1113 = vtanh.f32 %v539_v14  ;;  %v607_v56 = vmul.f32 0.5, %v1423_v4  ;;  %v636_v11 = vadd.f32 0.5, %v604_v54  ;;  %v717_v4 = vpop.permute.xlu0 %716 }
 0x11d   : > { %v1096_v19 = vpop.eup %1095  ;;  %v597_v20 = vmul.f32 0.5, %v1094_v15  ;;  %1115 = vtanh.f32 %v548_v7 }
 0x11e   : > { %v598_v23 = vmul.f32 0.5, %v1096_v19  ;;  %v628_v24 = vadd.f32 0.5, %v596_v35  ;;  %v1098_v25 = vpop.eup %1097  ;;  %1117 = vtanh.f32 %v549_v18  ;;  %v733_v7 = vpop.permute.xlu1 %732  ;;  %v637_v35 = vadd.f32 0.5, %v605_v51 }
 0x11f   : > { %v629_v49 = vadd.f32 0.5, %v597_v20  ;;  %v1100_v29 = vpop.eup %1099  ;;  %v599_v30 = vmul.f32 0.5, %v1098_v25  ;;  %1119 = vtanh.f32 %v550_v13  ;;  %v638_v19 = vadd.f32 0.5, %v606_v60 }
 0x120   : > { %v687_v17 = vmul.f32 %v1397_v8, %v628_v24  ;;  %v630_v31 = vadd.f32 0.5, %v598_v23  ;;  %v1102_v32 = vpop.eup %1101  ;;  %1121 = vtanh.f32 %v551_v28  ;;  %v608_v3 = vmul.f32 0.5, %v1100_v29 }
 0x121   : > { %v688_v33 = vmul.f32 %v1397_v8, %v629_v49  ;;  %v1104_v36 = vpop.eup %1103  ;;  %v631_v22 = vadd.f32 0.5, %v599_v30  ;;  %1123 = vtanh.f32 %v552_v26  ;;  %v554_v8 = vmul.f32 0.5, %v517_v62 }
 0x122   : > { %v689_v37 = vadd.f32 %v687_v17, %v681_v16  ;;  %v695_v38 = vmul.f32 %v693_v34, %v630_v31  ;;  %v1106_v39 = vpop.eup %1105  ;;  %1125 = vtanh.f32 %v553_v46  ;;  %v609_v52 = vmul.f32 0.5, %v1102_v32 }
 0x123   : > { %v690_v40 = vadd.f32 %v688_v33, %v682_v21  ;;  %v1108_v41 = vpop.eup %1107  ;;  %v600_v42 = vmul.f32 0.5, %v1106_v39  ;;  %v696_v44 = vmul.f32 %v693_v34, %v631_v22  ;;  %1127 = vtanh.f32 %v554_v8  ;;  %v749_v33 = vpop.permute.xlu1 %748 }
 0x124   : > { %v697_v45 = vadd.f32 %v695_v38, %v689_v37  ;;  %v601_v47 = vmul.f32 0.5, %v1108_v41  ;;  %v1110_v48 = vpop.eup %1109  ;;  %1129 = vtanh.f32 %v555_v53  ;;  %v610_v57 = vmul.f32 0.5, %v1104_v36  ;;  %v741_v38 = vpop.permute.xlu0 %740 }
 0x125   : > { %v632_v55 = vadd.f32 0.5, %v600_v42  ;;  %v698_v58 = vadd.f32 %v696_v44, %v690_v40  ;;  %v1112_v59 = vpop.eup %1111  ;;  %v611_v12 = vmul.f32 0.5, %v1110_v48  ;;  %v639_v24 = vadd.f32 0.5, %v607_v56 }
 0x126   : > { %v633_v61 = vadd.f32 0.5, %v601_v47  ;;  %v1114_v0 = vpop.eup %1113  ;;  %v602_v62 = vmul.f32 0.5, %v1112_v59  ;;  %v719_v25 = vmul.f32 %v717_v4, %v636_v11  ;;  %v640_v49 = vadd.f32 0.5, %v608_v3 }
 0x127   : > { %v703_v1 = vmul.f32 %v1409_v43, %v632_v55  ;;  %v1116_v2 = vpop.eup %1115  ;;  %v603_v6 = vmul.f32 0.5, %v1114_v0  ;;  %v641_v28 = vadd.f32 0.5, %v609_v52  ;;  %v720_v17 = vmul.f32 %v717_v4, %v637_v35  ;;  %v757_v56 = vpop.permute.xlu1 %756 }
 0x128   : > { %v704_v5 = vmul.f32 %v1409_v43, %v633_v61  ;;  %v1118_v9 = vpop.eup %1117  ;;  %v634_v10 = vadd.f32 0.5, %v602_v62  ;;  %v612_v43 = vmul.f32 0.5, %v1116_v2  ;;  %v642_v31 = vadd.f32 0.5, %v610_v57 }
 0x129   : > { %v705_v63 = vadd.f32 %v703_v1, %v697_v45  ;;  %v635_v14 = vadd.f32 0.5, %v603_v6  ;;  %v1120_v16 = vpop.eup %1119  ;;  %v613_v23 = vmul.f32 0.5, %v1118_v9  ;;  %v643_v32 = vadd.f32 0.5, %v611_v12 }
 0x12a   : > { %v706_v15 = vadd.f32 %v704_v5, %v698_v58  ;;  %v711_v18 = vmul.f32 %v1430_v27, %v634_v10  ;;  %v1122_v20 = vpop.eup %1121  ;;  %v614_v36 = vmul.f32 0.5, %v1120_v16  ;;  %v727_v37 = vmul.f32 %v725_v50, %v638_v19 }
 0x12b   : > { %v712_v21 = vmul.f32 %v1430_v27, %v635_v14  ;;  %v1124_v29 = vpop.eup %1123  ;;  %v615_v40 = vmul.f32 0.5, %v1122_v20  ;;  %v728_v26 = vmul.f32 %v725_v50, %v639_v24  ;;  %v735_v46 = vmul.f32 %v733_v7, %v640_v49  ;;  %v765_v50 = vpop.permute.xlu0 %764 }
 0x12c   : > { %v713_v13 = vadd.f32 %v711_v18, %v705_v63  ;;  %v1126_v34 = vpop.eup %1125  ;;  %v616_v39 = vmul.f32 0.5, %v1124_v29  ;;  %v736_v47 = vmul.f32 %v733_v7, %v641_v28  ;;  %v644_v8 = vadd.f32 0.5, %v612_v43  ;;  %v773_v12 = vpop.permute.xlu1 %772 }
 0x12d   : > { %v714_v30 = vadd.f32 %v712_v21, %v706_v15  ;;  %v1128_v27 = vpop.eup %1127  ;;  %v617_v42 = vmul.f32 0.5, %v1126_v34  ;;  %v743_v48 = vmul.f32 %v741_v38, %v642_v31  ;;  %v744_v54 = vmul.f32 %v741_v38, %v643_v32 }
 0x12e   : > { %v721_v22 = vadd.f32 %v719_v25, %v713_v13  ;;  %v1130_v44 = vpop.eup %1129  ;;  %v645_v55 = vadd.f32 0.5, %v613_v23  ;;  %v618_v58 = vmul.f32 0.5, %v1128_v27  ;;  %v646_v51 = vadd.f32 0.5, %v614_v36 }
 0x12f   : > { %v722_v41 = vadd.f32 %v720_v17, %v714_v30  ;;  %v648_v60 = vadd.f32 0.5, %v616_v39  ;;  %v619_v61 = vmul.f32 0.5, %v1130_v44  ;;  %v647_v1 = vadd.f32 0.5, %v615_v40 }
 0x130   : > { %v729_v45 = vadd.f32 %v727_v37, %v721_v22  ;;  %v649_v62 = vadd.f32 0.5, %v617_v42  ;;  %v751_v3 = vmul.f32 %v749_v33, %v644_v8  ;;  %v752_v5 = vmul.f32 %v749_v33, %v645_v55  ;;  %v782_v20 = vpop.permute.xlu1 %781 }
 0x131   : > { %v730_v53 = vadd.f32 %v728_v26, %v722_v41  ;;  %v759_v7 = vmul.f32 %v757_v56, %v646_v51  ;;  %v650_v9 = vadd.f32 0.5, %v618_v58  ;;  %v767_v57 = vmul.f32 %v765_v50, %v648_v60 }
 0x132   : > { %v737_v59 = vadd.f32 %v735_v46, %v729_v45  ;;  %v651_v10 = vadd.f32 0.5, %v619_v61  ;;  %v760_v11 = vmul.f32 %v757_v56, %v647_v1  ;;  %v768_v14 = vmul.f32 %v765_v50, %v649_v62 }
 0x133   : > { %v738_v0 = vadd.f32 %v736_v47, %v730_v53  ;;  %v775_v35 = vmul.f32 %v773_v12, %v650_v9 }
 0x134   : > { %v745_v2 = vadd.f32 %v743_v48, %v737_v59  ;;  %v776_v18 = vmul.f32 %v773_v12, %v651_v10 }
 0x135   : > { %v746_v52 = vadd.f32 %v744_v54, %v738_v0 }
 0x136   : > { %v753_v6 = vadd.f32 %v751_v3, %v745_v2 }
 0x137   : > { %v754_v63 = vadd.f32 %v752_v5, %v746_v52 }
 0x138   : > { %v761_v15 = vadd.f32 %v759_v7, %v753_v6 }
 0x139   : > { %v762_v4 = vadd.f32 %v760_v11, %v754_v63 }
 0x13a   : > { %v769_v16 = vadd.f32 %v767_v57, %v761_v15 }
 0x13b   : > { %v770_v19 = vadd.f32 %v768_v14, %v762_v4 }
 0x13c   : > { %v777_v21 = vadd.f32 %v775_v35, %v769_v16 }
 0x13d   : > { %v778_v43 = vadd.f32 %v776_v18, %v770_v19 }
 0x13e   : > { %v784_v23 = vadd.f32 %v782_v20, %v777_v21 }
 0x13f   : > { %v785_v24 = vadd.f32 %v782_v20, %v778_v43 }
 0x140   : > { %786 = vst [vmem:[%s290_s30] sm:$0xff] %v784_v23 }
 0x141   : > { %787 = vst [vmem:[%s290_s30 + $0x8] sm:$0xff] %v785_v24 }
 0x142   : > { %1144 = shalt.err (!%p1141_p7)
}
 0x143   : > { %s1145_s10 = scalar_lea.hbm %s1450_s8, 256  ;;  %s1149_s22 = scalar_lea.hbm %s1504_s4, 512 }
 0x144   : > { %p1146_p8 = scmp.ne.s32.totalorder %s1450_s8, %s1145_s10  ;;  %p1150_p13 = scmp.lt.u32.totalorder %s1450_s8, %s1504_s4 }
 0x145   : > { %p1151_p0 = scmp.lt.u32.totalorder %s1149_s22, %s1145_s10  ;;  %p1153_p2 = scmp.lt.u32.totalorder %s1145_s10, %s1450_s8 }
 0x146   : > { %p1147_p11 = pnand %p1146_p8, %p1293_p5 }
 0x147   : > { %p1152_p1 = por %p1151_p0, %p1150_p13 }
 0x148   : > { %p1148_p12 = pneg %p1147_p11 }
 0x149   : > { %p1154_p3 = por %p1153_p2, %p1152_p1 }
 0x14b   : > { %p1155_p4 = pnand %p1154_p3, %p1148_p12 }
 0x14d   : > { %1158 = shalt.err (!%p1155_p4)
}
 0x14e   : > { %966 = dma.vmem_to_hbm [thread:$0]  (%p1293_p5), %s1452_s5, 256, %s1450_s8, %s789_s9  }
 0x14f PF: > { %s817_s29 = sand.u32 1, %s1189_s15   ;;  %p969_p6 = pnand %p932_p10, %p1304_p9 }
 0x150   : > { %s818_s30 = scalar_lea.sflag [#allocation4], %s817_s29 }
 0x151   : > { %1184 = dma.done.wait (!%p969_p6), %s818_s30, 256  }
 0x152   : > { %1186 = vsyncadd (!%p969_p6), %s818_s30, 4294967040  ;;  %s17_s20 = sadd.s32 1, %s1209_s20   ;;  %s1507_s15 = smov %s1193_s16 }
 0x153   : > { %p14_p7 = scmp.ge.s32.totalorder %s17_s20, 4   ;;  %s1508_s16 = smov %s1197_s17 }
 0x154   : > { %s1509_s17 = smov %s1302_s27  ;;  %s1510_s18 = smov %s1205_s19 }
 0x155   : > { %s1511_s19 = smov %s1513_s23  ;;  %16 = sbr.rel (!%p14_p7) target bundleno = 4 (0x4), region = 123 }
 0x15c   :  { %823 = vsyncpa [#allocation4], 1 }
 0x15d   :  { %825 = vsyncpa [#allocation4 + $0x1], 1 }

</bundles_post_ra>
